<compile_context>
chip_gen: v7x
topology: tpu7x:2x2x1
jax: 0.10.0
libtpu: 0.0.40
codegen_flags: <defaults>
</compile_context>

<pallas_src>
import functools

import jax
import jax.numpy as jnp
from jax.experimental import pallas as pl
from jax.experimental.pallas import tpu as pltpu

BN_EPS = 1e-5


# --------------------------------------------------------------------- in-kernel helpers
def _im2col_3x3(h, W):
    """h: (C, H*W), spatial flattened row-major (p = y*W + x).

    Returns (9*C, H*W) where rows [t*C:(t+1)*C] hold tap t = ky*3 + kx, i.e. h shifted by
    (ky-1, kx-1) with zeros outside the H x W tile, so a single (Cout, 9*C) @ (9*C, H*W)
    MXU dot computes the whole 3x3 / stride-1 / pad-1 convolution.
    """
    C, HW = h.shape
    border = jnp.zeros((C, W + 1), h.dtype)
    padded = jnp.concatenate([border, h, border], axis=1)        # (C, HW + 2*(W+1))
    xpos = jax.lax.broadcasted_iota(jnp.int32, (1, HW), 1) % W
    not_left = xpos >= 1                                         # x-1 in range
    not_right = xpos <= W - 2                                    # x+1 in range
    taps = []
    for ky in range(3):
        for kx in range(3):
            s = (ky - 1) * W + (kx - 1)
            tap = padded[:, W + 1 + s: W + 1 + s + HW]           # h_flat[p + s], 0 outside
            if kx == 0:
                tap = jnp.where(not_left, tap, 0)
            elif kx == 2:
                tap = jnp.where(not_right, tap, 0)
            taps.append(tap)
    return jnp.concatenate(taps, axis=0)                         # (9*C, HW)


def _bn_relu(v, st_ref, gamma, beta, inv_n):
    """BatchNorm (batch stats, biased var) + affine + ReLU.  v: (C, HW) f32."""
    mean = st_ref[:, 0:1] * inv_n                                # (C, 1)
    var = jnp.maximum(st_ref[:, 1:2] * inv_n - mean * mean, 0.0)
    scale = gamma * jax.lax.rsqrt(var + BN_EPS)
    shift = beta - mean * scale
    return jnp.maximum(v * scale + shift, 0.0)


# ------------------------------------------------------------------------------- kernels
def _bn1_stats_kernel(x_ref, st1_ref):
    """Pass 1: per-batch-tile partial per-channel sum / sum-of-squares of x."""
    x = x_ref[0].astype(jnp.float32)                             # (Cin, HW)
    st1_ref[...] = jnp.concatenate(
        [jnp.sum(x, axis=1, keepdims=True),
         jnp.sum(x * x, axis=1, keepdims=True)], axis=1)[None]   # (1, Cin, 2)


def _bn1_conv1_kernel(st1_ref, x_ref, w1_ref, vec_ref, h1_ref, st2_ref,
                      *, W, C_in, C_out, count, compute_dtype):
    """Pass 2: BN1 + ReLU + conv1 as one im2col MXU dot; emit partial BN2 stats."""
    x = x_ref[0].astype(jnp.float32)                             # (Cin, HW)
    h = _bn_relu(x, st1_ref, vec_ref[:C_in, 0:1], vec_ref[:C_in, 1:2], 1.0 / count)
    patches = _im2col_3x3(h.astype(compute_dtype), W)            # (9*Cin, HW)
    acc = jnp.dot(w1_ref[...], patches,
                  preferred_element_type=jnp.float32) + vec_ref[:C_out, 2:3]
    h1 = acc.astype(h1_ref.dtype)                                # (Cout, HW)
    h1_ref[...] = h1[None]                                       # lane-dense store
    v = h1.astype(jnp.float32)                                   # stats match stored h1
    st2_ref[...] = jnp.concatenate(
        [jnp.sum(v, axis=1, keepdims=True),
         jnp.sum(v * v, axis=1, keepdims=True)], axis=1)[None]   # (1, Cout, 2)


def _bn2_conv2_kernel(st2_ref, x_ref, h1_ref, w2_ref, wsq_ref, vec_ref, out_ref,
                      *, W, count, compute_dtype):
    """Pass 3: BN2 + ReLU + conv2 (im2col MXU dot) + 1x1 shortcut + add."""
    h1 = h1_ref[0].astype(jnp.float32)                           # (Cout, HW)
    h2 = _bn_relu(h1, st2_ref, vec_ref[:, 0:1], vec_ref[:, 1:2], 1.0 / count)
    patches = _im2col_3x3(h2.astype(compute_dtype), W)           # (9*Cout, HW)
    acc = jnp.dot(w2_ref[...], patches,
                  preferred_element_type=jnp.float32) + vec_ref[:, 2:3]
    # 1x1 shortcut on the raw input: single (Cout, Cin) @ (Cin, HW) MXU dot.
    sc = jnp.dot(wsq_ref[...], x_ref[0].astype(compute_dtype),
                 preferred_element_type=jnp.float32) + vec_ref[:, 3:4]
    out_ref[...] = (acc + sc).astype(out_ref.dtype)[None]        # lane-dense store


# ------------------------------------------------------------------------------- wrapper
def _resblock_forward_impl(x_nchw, params, compute_dtype=jnp.float32):
    """NCHW in / NCHW out.  Three batch-gridded pallas_calls, all 'parallel'."""
    N, C_in, H, W = x_nchw.shape
    C_out = params["conv1_w"].shape[-1]
    Cmax = max(C_in, C_out)
    HW = H * W
    count = float(N * HW)
    cdt = compute_dtype
    h1_dtype = cdt                                    # bf16 h1 halves its HBM round trip
    bpe = 2 if cdt == jnp.bfloat16 else 4

    # Channels-major flat layout: free reshape, no transpose, no extra HBM traffic.
    x = x_nchw.astype(jnp.float32).reshape(N, C_in, HW)

    # Conv weights -> taps-major (Cout, 9*Cin) matrices for the single im2col dot,
    # pre-cast once to the MXU dtype (resident in VMEM across grid steps).
    w1 = jnp.transpose(params["conv1_w"], (3, 0, 1, 2)).reshape(C_out, 9 * C_in).astype(cdt)
    w2 = jnp.transpose(params["conv2_w"], (3, 0, 1, 2)).reshape(C_out, 9 * C_out).astype(cdt)
    wsq = jnp.transpose(params["sqz_w"], (1, 0)).astype(cdt)              # (Cout, Cin)

    def col(v, rows):
        v = v.astype(jnp.float32).reshape(-1, 1)
        return jnp.pad(v, ((0, rows - v.shape[0]), (0, 0)))

    # Per-channel vectors packed as columns of one tiny array per pass (1 DMA instead of 7).
    vec2 = jnp.concatenate([col(params["bn1_g"], Cmax), col(params["bn1_b"], Cmax),
                            col(params["conv1_b"], Cmax),
                            jnp.zeros((Cmax, 1), jnp.float32)], axis=1)   # (Cmax, 4)
    vec3 = jnp.concatenate([col(params["bn2_g"], C_out), col(params["bn2_b"], C_out),
                            col(params["conv2_b"], C_out),
                            col(params["sqz_b"], C_out)], axis=1)         # (Cout, 4)

    x_spec = pl.BlockSpec((1, C_in, HW), lambda b: (b, 0, 0))
    h1_spec = pl.BlockSpec((1, C_out, HW), lambda b: (b, 0, 0))
    st1_spec = pl.BlockSpec((1, C_in, 2), lambda b: (b, 0, 0))
    st2_spec = pl.BlockSpec((1, C_out, 2), lambda b: (b, 0, 0))
    full2 = lambda shape: pl.BlockSpec(shape, lambda b: (0, 0))
    parallel = pltpu.CompilerParams(dimension_semantics=("parallel",))

    # ---- pass 1: BN1 per-tile partial stats; trivial XLA reduction of the partials ----
    st1 = jnp.sum(
        pl.pallas_call(
            _bn1_stats_kernel,
            grid=(N,),
            in_specs=[x_spec],
            out_specs=st1_spec,
            out_shape=jax.ShapeDtypeStruct((N, C_in, 2), jnp.float32),
            compiler_params=parallel,
        )(x),
        axis=0)                                                           # (Cin, 2)

    # ---- pass 2: BN1 + ReLU + conv1 (MXU); per-tile BN2 partial stats ------------------
    h1, st2p = pl.pallas_call(
        functools.partial(_bn1_conv1_kernel, W=W, C_in=C_in, C_out=C_out,
                          count=count, compute_dtype=cdt),
        grid=(N,),
        in_specs=[full2((C_in, 2)), x_spec, full2((C_out, 9 * C_in)), full2((Cmax, 4))],
        out_specs=(h1_spec, st2_spec),
        out_shape=(jax.ShapeDtypeStruct((N, C_out, HW), h1_dtype),
                   jax.ShapeDtypeStruct((N, C_out, 2), jnp.float32)),
        compiler_params=parallel,
        cost_estimate=pl.CostEstimate(
            flops=int(2 * N * HW * 9 * C_in * C_out),
            transcendentals=0,
            bytes_accessed=int(4 * N * C_in * HW
                               + bpe * (9 * C_in * C_out + N * C_out * HW))),
    )(st1, x, w1, vec2)
    st2 = jnp.sum(st2p, axis=0)                                           # (Cout, 2)

    # ---- pass 3: BN2 + ReLU + conv2 + 1x1 shortcut + add -------------------------------
    out = pl.pallas_call(
        functools.partial(_bn2_conv2_kernel, W=W, count=count, compute_dtype=cdt),
        grid=(N,),
        in_specs=[full2((C_out, 2)), x_spec, h1_spec,
                  full2((C_out, 9 * C_out)), full2((C_out, C_in)), full2((C_out, 4))],
        out_specs=h1_spec,
        out_shape=jax.ShapeDtypeStruct((N, C_out, HW), jnp.float32),
        compiler_params=parallel,
        cost_estimate=pl.CostEstimate(
            flops=int(2 * N * HW * (9 * C_out + C_in) * C_out),
            transcendentals=0,
            bytes_accessed=int(4 * N * (C_in + C_out) * HW + bpe * N * C_out * HW
                               + bpe * C_out * (9 * C_out + C_in))),
    )(st2, x, h1, w2, wsq, vec3)

    return out.reshape(N, C_out, H, W)                                    # NCHW, free


resblock_forward = jax.jit(_resblock_forward_impl, static_argnames=("compute_dtype",))


# ----------------------------------------------------------------------------- reference
def resblock_ref(x_nchw, params):
    """Pure-JAX reference (NCHW) for numerical verification."""
    x = x_nchw.astype(jnp.float32)

    def bn(v, g, b):
        m = jnp.mean(v, axis=(0, 2, 3), keepdims=True)
        var = jnp.mean((v - m) ** 2, axis=(0, 2, 3), keepdims=True)
        return (v - m) * jax.lax.rsqrt(var + BN_EPS) * g.reshape(1, -1, 1, 1) \
            + b.reshape(1, -1, 1, 1)

    def conv3(v, w_hwio, b):
        y = jax.lax.conv_general_dilated(
            v, w_hwio, (1, 1), "SAME",
            dimension_numbers=("NCHW", "HWIO", "NCHW"))
        return y + b.reshape(1, -1, 1, 1)

    h = jnp.maximum(bn(x, params["bn1_g"], params["bn1_b"]), 0.0)
    h = conv3(h, params["conv1_w"], params["conv1_b"])
    h = jnp.maximum(bn(h, params["bn2_g"], params["bn2_b"]), 0.0)
    h = conv3(h, params["conv2_w"], params["conv2_b"])
    sq = jax.lax.conv_general_dilated(
        x, params["sqz_w"][None, None], (1, 1), "VALID",
        dimension_numbers=("NCHW", "HWIO", "NCHW")) \
        + params["sqz_b"].reshape(1, -1, 1, 1)
    return h + sq


if __name__ == "__main__":
    key = jax.random.PRNGKey(0)
    N, C_in, H, W = 2, 4, 16, 16
    C_out = 8

    ks = jax.random.split(key, 11)
    x = jax.random.normal(ks[0], (N, C_in, H, W), jnp.float32)
    params = {
        "bn1_g":   jax.random.uniform(ks[1], (C_in,), jnp.float32, 0.5, 1.5),
        "bn1_b":   0.1 * jax.random.normal(ks[2], (C_in,), jnp.float32),
        "conv1_w": 0.2 * jax.random.normal(ks[3], (3, 3, C_in, C_out), jnp.float32),
        "conv1_b": 0.1 * jax.random.normal(ks[4], (C_out,), jnp.float32),
        "bn2_g":   jax.random.uniform(ks[5], (C_out,), jnp.float32, 0.5, 1.5),
        "bn2_b":   0.1 * jax.random.normal(ks[6], (C_out,), jnp.float32),
        "conv2_w": 0.2 * jax.random.normal(ks[7], (3, 3, C_out, C_out), jnp.float32),
        "conv2_b": 0.1 * jax.random.normal(ks[8], (C_out,), jnp.float32),
        "sqz_w":   0.2 * jax.random.normal(ks[9], (C_in, C_out), jnp.float32),
        "sqz_b":   0.1 * jax.random.normal(ks[10], (C_out,), jnp.float32),
    }

    ref = jax.block_until_ready(resblock_ref(x, params))

    # f32 MXU operands: strict check against the f32 reference.
    out = jax.block_until_ready(resblock_forward(x, params, compute_dtype=jnp.float32))
    assert out.shape == (N, C_out, H, W), out.shape
    err_f32 = float(jnp.max(jnp.abs(out - ref)))
    if err_f32 > 2e-3:
        raise AssertionError(f"f32 kernel/reference mismatch: max abs err = {err_f32}")

    # bf16 MXU operands (f32 accumulation) + bf16 h1 HBM intermediate: the fast path on
    # v5e/v6e/v7x.  Looser tolerance accounts for bf16 operand rounding through two
    # stacked 3x3 convs (still checked against the f32 reference).
    out_bf = jax.block_until_ready(resblock_forward(x, params, compute_dtype=jnp.bfloat16))
    err_bf = float(jnp.max(jnp.abs(out_bf - ref)))
    if err_bf > 6e-2:
        raise AssertionError(f"bf16 kernel/reference mismatch: max abs err = {err_bf}")

    print("KERNEL_OK")
</pallas_src>

<mosaic_0001>
module attributes {stable_mosaic.version = 11 : i64} {
  func.func @_bn1_stats_kernel(%arg0: i32, %arg1: memref<1x4x256xf32, #tpu.memory_space<vmem>>, %arg2: memref<1x4x2xf32, #tpu.memory_space<vmem>>) attributes {dimension_semantics = [#tpu.dimension_semantics<parallel>], iteration_bounds = array<i64: 2>, scalar_prefetch = 0 : i64, scratch_operands = 0 : i64, tpu.core_type = #tpu.core_type<tc>, window_params = [{transform_indices = @transform_0, window_bounds = array<i64: 1, 4, 256>}, {transform_indices = @transform_1, window_bounds = array<i64: 1, 4, 2>}]} {
    %c0 = arith.constant 0 : index
    %c0_0 = arith.constant 0 : index
    %c0_1 = arith.constant 0 : index
    %0 = vector.load %arg1[%c0, %c0_0, %c0_1] : memref<1x4x256xf32, #tpu.memory_space<vmem>>, vector<1x4x256xf32>
    %1 = vector.shape_cast %0 : vector<1x4x256xf32> to vector<4x256xf32>
    %cst = arith.constant dense<0.000000e+00> : vector<4xf32>
    %2 = vector.multi_reduction <add>, %1, %cst [1] : vector<4x256xf32> to vector<4xf32>
    %3 = vector.shape_cast %2 : vector<4xf32> to vector<4x1xf32>
    %4 = arith.mulf %1, %1 : vector<4x256xf32>
    %cst_2 = arith.constant dense<0.000000e+00> : vector<4xf32>
    %5 = vector.multi_reduction <add>, %4, %cst_2 [1] : vector<4x256xf32> to vector<4xf32>
    %6 = vector.shape_cast %5 : vector<4xf32> to vector<4x1xf32>
    %7 = tpu.concatenate %3, %6 in 1 : vector<4x1xf32>, vector<4x1xf32> -> vector<4x2xf32>
    %8 = vector.shape_cast %7 : vector<4x2xf32> to vector<1x4x2xf32>
    %c0_3 = arith.constant 0 : index
    %c0_4 = arith.constant 0 : index
    %c0_5 = arith.constant 0 : index
    %9 = vector.load %arg2[%c0_3, %c0_4, %c0_5] : memref<1x4x2xf32, #tpu.memory_space<vmem>>, vector<1x4x2xf32>
    tpu.vector_store %arg2[%c0_3, %c0_4, %c0_5], %8 {strides = array<i32>} : memref<1x4x2xf32, #tpu.memory_space<vmem>>, vector<1x4x2xf32>,
    return
  }
  func.func @transform_0(%arg0: i32) -> (i32, i32, i32) {
    %c0_i32 = arith.constant 0 : i32
    %c0_i32_0 = arith.constant 0 : i32
    %c0_i32_1 = arith.constant 0 : i32
    return %arg0, %c0_i32, %c0_i32_0 : i32, i32, i32
  }
  func.func @transform_1(%arg0: i32) -> (i32, i32, i32) {
    %c0_i32 = arith.constant 0 : i32
    %c0_i32_0 = arith.constant 0 : i32
    %c0_i32_1 = arith.constant 0 : i32
    return %arg0, %c0_i32, %c0_i32_0 : i32, i32, i32
  }
}

module attributes {stable_mosaic.version = 11 : i64} {
  func.func @_bn1_conv1_kernel(%arg0: i32, %arg1: memref<4x2xf32, #tpu.memory_space<vmem>>, %arg2: memref<1x4x256xf32, #tpu.memory_space<vmem>>, %arg3: memref<8x36xf32, #tpu.memory_space<vmem>>, %arg4: memref<8x4xf32, #tpu.memory_space<vmem>>, %arg5: memref<1x8x256xf32, #tpu.memory_space<vmem>>, %arg6: memref<1x8x2xf32, #tpu.memory_space<vmem>>) attributes {dimension_semantics = [#tpu.dimension_semantics<parallel>], iteration_bounds = array<i64: 2>, scalar_prefetch = 0 : i64, scratch_operands = 0 : i64, tpu.core_type = #tpu.core_type<tc>, window_params = [{pipeline_mode = #tpu.pipeline_mode<synchronous>, transform_indices = @transform_0, window_bounds = array<i64: 4, 2>}, {transform_indices = @transform_1, window_bounds = array<i64: 1, 4, 256>}, {pipeline_mode = #tpu.pipeline_mode<synchronous>, transform_indices = @transform_2, window_bounds = array<i64: 8, 36>}, {pipeline_mode = #tpu.pipeline_mode<synchronous>, transform_indices = @transform_3, window_bounds = array<i64: 8, 4>}, {transform_indices = @transform_4, window_bounds = array<i64: 1, 8, 256>}, {transform_indices = @transform_5, window_bounds = array<i64: 1, 8, 2>}]} {
    %c0 = arith.constant 0 : index
    %c0_0 = arith.constant 0 : index
    %c0_1 = arith.constant 0 : index
    %0 = vector.load %arg2[%c0, %c0_0, %c0_1] : memref<1x4x256xf32, #tpu.memory_space<vmem>>, vector<1x4x256xf32>
    %1 = vector.shape_cast %0 : vector<1x4x256xf32> to vector<4x256xf32>
    %c0_2 = arith.constant 0 : index
    %c0_3 = arith.constant 0 : index
    %2 = vector.load %arg4[%c0_2, %c0_3] : memref<8x4xf32, #tpu.memory_space<vmem>>, vector<4x1xf32>
    %c0_4 = arith.constant 0 : index
    %c1 = arith.constant 1 : index
    %3 = vector.load %arg4[%c0_4, %c1] : memref<8x4xf32, #tpu.memory_space<vmem>>, vector<4x1xf32>
    %c0_5 = arith.constant 0 : index
    %c0_6 = arith.constant 0 : index
    %4 = vector.load %arg1[%c0_5, %c0_6] : memref<4x2xf32, #tpu.memory_space<vmem>>, vector<4x1xf32>
    %cst = arith.constant 0.001953125 : f32
    %5 = vector.broadcast %cst : f32 to vector<4x1xf32>
    %6 = arith.mulf %4, %5 : vector<4x1xf32>
    %c0_7 = arith.constant 0 : index
    %c1_8 = arith.constant 1 : index
    %7 = vector.load %arg1[%c0_7, %c1_8] : memref<4x2xf32, #tpu.memory_space<vmem>>, vector<4x1xf32>
    %cst_9 = arith.constant 0.001953125 : f32
    %8 = vector.broadcast %cst_9 : f32 to vector<4x1xf32>
    %9 = arith.mulf %7, %8 : vector<4x1xf32>
    %10 = arith.mulf %6, %6 : vector<4x1xf32>
    %11 = arith.subf %9, %10 : vector<4x1xf32>
    %cst_10 = arith.constant 0.000000e+00 : f32
    %12 = vector.broadcast %cst_10 : f32 to vector<4x1xf32>
    %13 = arith.maximumf %11, %12 : vector<4x1xf32>
    %cst_11 = arith.constant 9.99999974E-6 : f32
    %14 = vector.broadcast %cst_11 : f32 to vector<4x1xf32>
    %15 = arith.addf %13, %14 : vector<4x1xf32>
    %16 = math.rsqrt %15 : vector<4x1xf32>
    %17 = arith.mulf %2, %16 : vector<4x1xf32>
    %18 = arith.mulf %6, %17 : vector<4x1xf32>
    %19 = arith.subf %3, %18 : vector<4x1xf32>
    %20 = vector.broadcast %17 : vector<4x1xf32> to vector<4x256xf32>
    %21 = arith.mulf %1, %20 : vector<4x256xf32>
    %22 = vector.broadcast %19 : vector<4x1xf32> to vector<4x256xf32>
    %23 = arith.addf %21, %22 : vector<4x256xf32>
    %cst_12 = arith.constant 0.000000e+00 : f32
    %24 = vector.broadcast %cst_12 : f32 to vector<4x256xf32>
    %25 = arith.maximumf %23, %24 : vector<4x256xf32>
    %cst_13 = arith.constant 0.000000e+00 : f32
    %26 = vector.broadcast %cst_13 : f32 to vector<4x17xf32>
    %27 = tpu.concatenate %26, %25, %26 in 1 : vector<4x17xf32>, vector<4x256xf32>, vector<4x17xf32> -> vector<4x290xf32>
    %28 = tpu.iota {dimensions = array<i32: 1>} : vector<1x256xi32>
    %c16_i32 = arith.constant 16 : i32
    %c0_i32 = arith.constant 0 : i32
    %29 = arith.cmpi eq, %c16_i32, %c0_i32 : i32
    %c1_i32 = arith.constant 1 : i32
    %30 = arith.select %29, %c1_i32, %c16_i32 : i32
    %31 = vector.broadcast %30 : i32 to vector<1x256xi32>
    %32 = arith.remsi %28, %31 : vector<1x256xi32>
    %c0_i32_14 = arith.constant 0 : i32
    %33 = vector.broadcast %c0_i32_14 : i32 to vector<1x256xi32>
    %34 = arith.cmpi ne, %32, %33 : vector<1x256xi32>
    %c0_i32_15 = arith.constant 0 : i32
    %35 = vector.broadcast %c0_i32_15 : i32 to vector<1x256xi32>
    %36 = arith.cmpi slt, %32, %35 : vector<1x256xi32>
    %c0_i32_16 = arith.constant 0 : i32
    %37 = arith.cmpi slt, %30, %c0_i32_16 : i32
    %38 = vector.broadcast %37 : i1 to vector<1x256xi1>
    %39 = vector.broadcast %38 : vector<1x256xi1> to vector<1x256xi1>
    %40 = arith.xori %36, %39 : vector<1x256xi1>
    %41 = arith.andi %40, %34 : vector<1x256xi1>
    %42 = vector.broadcast %30 : i32 to vector<1x256xi32>
    %43 = arith.addi %32, %42 : vector<1x256xi32>
    %44 = arith.select %41, %43, %32 : vector<1x256xi1>, vector<1x256xi32>
    %c1_i32_17 = arith.constant 1 : i32
    %45 = vector.broadcast %c1_i32_17 : i32 to vector<1x256xi32>
    %46 = arith.cmpi sge, %44, %45 : vector<1x256xi32>
    %c14_i32 = arith.constant 14 : i32
    %47 = vector.broadcast %c14_i32 : i32 to vector<1x256xi32>
    %48 = arith.cmpi sle, %44, %47 : vector<1x256xi32>
    %49 = vector.extract_strided_slice %27 {offsets = [0, 0], sizes = [4, 256], strides = [1, 1]} : vector<4x290xf32> to vector<4x256xf32>
    %c0_i32_18 = arith.constant 0 : i32
    %50 = arith.sitofp %c0_i32_18 : i32 to f32
    %51 = vector.shape_cast %46 : vector<1x256xi1> to vector<1x256xi1>
    %52 = vector.broadcast %51 : vector<1x256xi1> to vector<4x256xi1>
    %53 = vector.broadcast %50 : f32 to vector<4x256xf32>
    %54 = arith.select %52, %49, %53 : vector<4x256xi1>, vector<4x256xf32>
    %55 = vector.extract_strided_slice %27 {offsets = [0, 1], sizes = [4, 256], strides = [1, 1]} : vector<4x290xf32> to vector<4x256xf32>
    %56 = vector.extract_strided_slice %27 {offsets = [0, 2], sizes = [4, 256], strides = [1, 1]} : vector<4x290xf32> to vector<4x256xf32>
    %c0_i32_19 = arith.constant 0 : i32
    %57 = arith.sitofp %c0_i32_19 : i32 to f32
    %58 = vector.shape_cast %48 : vector<1x256xi1> to vector<1x256xi1>
    %59 = vector.broadcast %58 : vector<1x256xi1> to vector<4x256xi1>
    %60 = vector.broadcast %57 : f32 to vector<4x256xf32>
    %61 = arith.select %59, %56, %60 : vector<4x256xi1>, vector<4x256xf32>
    %62 = vector.extract_strided_slice %27 {offsets = [0, 16], sizes = [4, 256], strides = [1, 1]} : vector<4x290xf32> to vector<4x256xf32>
    %c0_i32_20 = arith.constant 0 : i32
    %63 = arith.sitofp %c0_i32_20 : i32 to f32
    %64 = vector.shape_cast %46 : vector<1x256xi1> to vector<1x256xi1>
    %65 = vector.broadcast %64 : vector<1x256xi1> to vector<4x256xi1>
    %66 = vector.broadcast %63 : f32 to vector<4x256xf32>
    %67 = arith.select %65, %62, %66 : vector<4x256xi1>, vector<4x256xf32>
    %68 = vector.extract_strided_slice %27 {offsets = [0, 17], sizes = [4, 256], strides = [1, 1]} : vector<4x290xf32> to vector<4x256xf32>
    %69 = vector.extract_strided_slice %27 {offsets = [0, 18], sizes = [4, 256], strides = [1, 1]} : vector<4x290xf32> to vector<4x256xf32>
    %c0_i32_21 = arith.constant 0 : i32
    %70 = arith.sitofp %c0_i32_21 : i32 to f32
    %71 = vector.shape_cast %48 : vector<1x256xi1> to vector<1x256xi1>
    %72 = vector.broadcast %71 : vector<1x256xi1> to vector<4x256xi1>
    %73 = vector.broadcast %70 : f32 to vector<4x256xf32>
    %74 = arith.select %72, %69, %73 : vector<4x256xi1>, vector<4x256xf32>
    %75 = vector.extract_strided_slice %27 {offsets = [0, 32], sizes = [4, 256], strides = [1, 1]} : vector<4x290xf32> to vector<4x256xf32>
    %c0_i32_22 = arith.constant 0 : i32
    %76 = arith.sitofp %c0_i32_22 : i32 to f32
    %77 = vector.shape_cast %46 : vector<1x256xi1> to vector<1x256xi1>
    %78 = vector.broadcast %77 : vector<1x256xi1> to vector<4x256xi1>
    %79 = vector.broadcast %76 : f32 to vector<4x256xf32>
    %80 = arith.select %78, %75, %79 : vector<4x256xi1>, vector<4x256xf32>
    %81 = vector.extract_strided_slice %27 {offsets = [0, 33], sizes = [4, 256], strides = [1, 1]} : vector<4x290xf32> to vector<4x256xf32>
    %82 = vector.extract_strided_slice %27 {offsets = [0, 34], sizes = [4, 256], strides = [1, 1]} : vector<4x290xf32> to vector<4x256xf32>
    %c0_i32_23 = arith.constant 0 : i32
    %83 = arith.sitofp %c0_i32_23 : i32 to f32
    %84 = vector.shape_cast %48 : vector<1x256xi1> to vector<1x256xi1>
    %85 = vector.broadcast %84 : vector<1x256xi1> to vector<4x256xi1>
    %86 = vector.broadcast %83 : f32 to vector<4x256xf32>
    %87 = arith.select %85, %82, %86 : vector<4x256xi1>, vector<4x256xf32>
    %88 = tpu.concatenate %54, %55, %61, %67, %68, %74, %80, %81, %87 in 0 : vector<4x256xf32>, vector<4x256xf32>, vector<4x256xf32>, vector<4x256xf32>, vector<4x256xf32>, vector<4x256xf32>, vector<4x256xf32>, vector<4x256xf32>, vector<4x256xf32> -> vector<36x256xf32>
    %c0_24 = arith.constant 0 : index
    %c0_25 = arith.constant 0 : index
    %89 = vector.load %arg3[%c0_24, %c0_25] : memref<8x36xf32, #tpu.memory_space<vmem>>, vector<8x36xf32>
    %cst_26 = arith.constant dense<0.000000e+00> : vector<8x256xf32>
    %90 = tpu.matmul %89, %88, %cst_26 {dimension_numbers = #tpu.dot_dimension_numbers<[1], [0], [0], [1], [0, 0, 1, 1], [], []>} : vector<8x36xf32>, vector<36x256xf32>, vector<8x256xf32> -> vector<8x256xf32>
    %c0_27 = arith.constant 0 : index
    %c2 = arith.constant 2 : index
    %91 = vector.load %arg4[%c0_27, %c2] : memref<8x4xf32, #tpu.memory_space<vmem>>, vector<8x1xf32>
    %92 = vector.broadcast %91 : vector<8x1xf32> to vector<8x256xf32>
    %93 = arith.addf %90, %92 : vector<8x256xf32>
    %94 = vector.shape_cast %93 : vector<8x256xf32> to vector<1x8x256xf32>
    %c0_28 = arith.constant 0 : index
    %c0_29 = arith.constant 0 : index
    %c0_30 = arith.constant 0 : index
    %95 = vector.load %arg5[%c0_28, %c0_29, %c0_30] : memref<1x8x256xf32, #tpu.memory_space<vmem>>, vector<1x8x256xf32>
    tpu.vector_store %arg5[%c0_28, %c0_29, %c0_30], %94 {strides = array<i32>} : memref<1x8x256xf32, #tpu.memory_space<vmem>>, vector<1x8x256xf32>,
    %cst_31 = arith.constant dense<0.000000e+00> : vector<8xf32>
    %96 = vector.multi_reduction <add>, %93, %cst_31 [1] : vector<8x256xf32> to vector<8xf32>
    %97 = vector.shape_cast %96 : vector<8xf32> to vector<8x1xf32>
    %98 = arith.mulf %93, %93 : vector<8x256xf32>
    %cst_32 = arith.constant dense<0.000000e+00> : vector<8xf32>
    %99 = vector.multi_reduction <add>, %98, %cst_32 [1] : vector<8x256xf32> to vector<8xf32>
    %100 = vector.shape_cast %99 : vector<8xf32> to vector<8x1xf32>
    %101 = tpu.concatenate %97, %100 in 1 : vector<8x1xf32>, vector<8x1xf32> -> vector<8x2xf32>
    %102 = vector.shape_cast %101 : vector<8x2xf32> to vector<1x8x2xf32>
    %c0_33 = arith.constant 0 : index
    %c0_34 = arith.constant 0 : index
    %c0_35 = arith.constant 0 : index
    %103 = vector.load %arg6[%c0_33, %c0_34, %c0_35] : memref<1x8x2xf32, #tpu.memory_space<vmem>>, vector<1x8x2xf32>
    tpu.vector_store %arg6[%c0_33, %c0_34, %c0_35], %102 {strides = array<i32>} : memref<1x8x2xf32, #tpu.memory_space<vmem>>, vector<1x8x2xf32>,
    return
  }
  func.func @transform_0(%arg0: i32) -> (i32, i32) {
    %c0_i32 = arith.constant 0 : i32
    %c0_i32_0 = arith.constant 0 : i32
    %c0_i32_1 = arith.constant 0 : i32
    return %c0_i32, %c0_i32_0 : i32, i32
  }
  func.func @transform_1(%arg0: i32) -> (i32, i32, i32) {
    %c0_i32 = arith.constant 0 : i32
    %c0_i32_0 = arith.constant 0 : i32
    %c0_i32_1 = arith.constant 0 : i32
    return %arg0, %c0_i32, %c0_i32_0 : i32, i32, i32
  }
  func.func @transform_2(%arg0: i32) -> (i32, i32) {
    %c0_i32 = arith.constant 0 : i32
    %c0_i32_0 = arith.constant 0 : i32
    %c0_i32_1 = arith.constant 0 : i32
    return %c0_i32, %c0_i32_0 : i32, i32
  }
  func.func @transform_3(%arg0: i32) -> (i32, i32) {
    %c0_i32 = arith.constant 0 : i32
    %c0_i32_0 = arith.constant 0 : i32
    %c0_i32_1 = arith.constant 0 : i32
    return %c0_i32, %c0_i32_0 : i32, i32
  }
  func.func @transform_4(%arg0: i32) -> (i32, i32, i32) {
    %c0_i32 = arith.constant 0 : i32
    %c0_i32_0 = arith.constant 0 : i32
    %c0_i32_1 = arith.constant 0 : i32
    return %arg0, %c0_i32, %c0_i32_0 : i32, i32, i32
  }
  func.func @transform_5(%arg0: i32) -> (i32, i32, i32) {
    %c0_i32 = arith.constant 0 : i32
    %c0_i32_0 = arith.constant 0 : i32
    %c0_i32_1 = arith.constant 0 : i32
    return %arg0, %c0_i32, %c0_i32_0 : i32, i32, i32
  }
}

module attributes {stable_mosaic.version = 11 : i64} {
  func.func @_bn2_conv2_kernel(%arg0: i32, %arg1: memref<8x2xf32, #tpu.memory_space<vmem>>, %arg2: memref<1x4x256xf32, #tpu.memory_space<vmem>>, %arg3: memref<1x8x256xf32, #tpu.memory_space<vmem>>, %arg4: memref<8x72xf32, #tpu.memory_space<vmem>>, %arg5: memref<8x4xf32, #tpu.memory_space<vmem>>, %arg6: memref<8x4xf32, #tpu.memory_space<vmem>>, %arg7: memref<1x8x256xf32, #tpu.memory_space<vmem>>) attributes {dimension_semantics = [#tpu.dimension_semantics<parallel>], iteration_bounds = array<i64: 2>, scalar_prefetch = 0 : i64, scratch_operands = 0 : i64, tpu.core_type = #tpu.core_type<tc>, window_params = [{pipeline_mode = #tpu.pipeline_mode<synchronous>, transform_indices = @transform_0, window_bounds = array<i64: 8, 2>}, {transform_indices = @transform_1, window_bounds = array<i64: 1, 4, 256>}, {transform_indices = @transform_2, window_bounds = array<i64: 1, 8, 256>}, {pipeline_mode = #tpu.pipeline_mode<synchronous>, transform_indices = @transform_3, window_bounds = array<i64: 8, 72>}, {pipeline_mode = #tpu.pipeline_mode<synchronous>, transform_indices = @transform_4, window_bounds = array<i64: 8, 4>}, {pipeline_mode = #tpu.pipeline_mode<synchronous>, transform_indices = @transform_5, window_bounds = array<i64: 8, 4>}, {transform_indices = @transform_6, window_bounds = array<i64: 1, 8, 256>}]} {
    %c0 = arith.constant 0 : index
    %c0_0 = arith.constant 0 : index
    %c0_1 = arith.constant 0 : index
    %0 = vector.load %arg3[%c0, %c0_0, %c0_1] : memref<1x8x256xf32, #tpu.memory_space<vmem>>, vector<1x8x256xf32>
    %1 = vector.shape_cast %0 : vector<1x8x256xf32> to vector<8x256xf32>
    %c0_2 = arith.constant 0 : index
    %c0_3 = arith.constant 0 : index
    %2 = vector.load %arg6[%c0_2, %c0_3] : memref<8x4xf32, #tpu.memory_space<vmem>>, vector<8x1xf32>
    %c0_4 = arith.constant 0 : index
    %c1 = arith.constant 1 : index
    %3 = vector.load %arg6[%c0_4, %c1] : memref<8x4xf32, #tpu.memory_space<vmem>>, vector<8x1xf32>
    %c0_5 = arith.constant 0 : index
    %c0_6 = arith.constant 0 : index
    %4 = vector.load %arg1[%c0_5, %c0_6] : memref<8x2xf32, #tpu.memory_space<vmem>>, vector<8x1xf32>
    %cst = arith.constant 0.001953125 : f32
    %5 = vector.broadcast %cst : f32 to vector<8x1xf32>
    %6 = arith.mulf %4, %5 : vector<8x1xf32>
    %c0_7 = arith.constant 0 : index
    %c1_8 = arith.constant 1 : index
    %7 = vector.load %arg1[%c0_7, %c1_8] : memref<8x2xf32, #tpu.memory_space<vmem>>, vector<8x1xf32>
    %cst_9 = arith.constant 0.001953125 : f32
    %8 = vector.broadcast %cst_9 : f32 to vector<8x1xf32>
    %9 = arith.mulf %7, %8 : vector<8x1xf32>
    %10 = arith.mulf %6, %6 : vector<8x1xf32>
    %11 = arith.subf %9, %10 : vector<8x1xf32>
    %cst_10 = arith.constant 0.000000e+00 : f32
    %12 = vector.broadcast %cst_10 : f32 to vector<8x1xf32>
    %13 = arith.maximumf %11, %12 : vector<8x1xf32>
    %cst_11 = arith.constant 9.99999974E-6 : f32
    %14 = vector.broadcast %cst_11 : f32 to vector<8x1xf32>
    %15 = arith.addf %13, %14 : vector<8x1xf32>
    %16 = math.rsqrt %15 : vector<8x1xf32>
    %17 = arith.mulf %2, %16 : vector<8x1xf32>
    %18 = arith.mulf %6, %17 : vector<8x1xf32>
    %19 = arith.subf %3, %18 : vector<8x1xf32>
    %20 = vector.broadcast %17 : vector<8x1xf32> to vector<8x256xf32>
    %21 = arith.mulf %1, %20 : vector<8x256xf32>
    %22 = vector.broadcast %19 : vector<8x1xf32> to vector<8x256xf32>
    %23 = arith.addf %21, %22 : vector<8x256xf32>
    %cst_12 = arith.constant 0.000000e+00 : f32
    %24 = vector.broadcast %cst_12 : f32 to vector<8x256xf32>
    %25 = arith.maximumf %23, %24 : vector<8x256xf32>
    %cst_13 = arith.constant 0.000000e+00 : f32
    %26 = vector.broadcast %cst_13 : f32 to vector<8x17xf32>
    %27 = tpu.concatenate %26, %25, %26 in 1 : vector<8x17xf32>, vector<8x256xf32>, vector<8x17xf32> -> vector<8x290xf32>
    %28 = tpu.iota {dimensions = array<i32: 1>} : vector<1x256xi32>
    %c16_i32 = arith.constant 16 : i32
    %c0_i32 = arith.constant 0 : i32
    %29 = arith.cmpi eq, %c16_i32, %c0_i32 : i32
    %c1_i32 = arith.constant 1 : i32
    %30 = arith.select %29, %c1_i32, %c16_i32 : i32
    %31 = vector.broadcast %30 : i32 to vector<1x256xi32>
    %32 = arith.remsi %28, %31 : vector<1x256xi32>
    %c0_i32_14 = arith.constant 0 : i32
    %33 = vector.broadcast %c0_i32_14 : i32 to vector<1x256xi32>
    %34 = arith.cmpi ne, %32, %33 : vector<1x256xi32>
    %c0_i32_15 = arith.constant 0 : i32
    %35 = vector.broadcast %c0_i32_15 : i32 to vector<1x256xi32>
    %36 = arith.cmpi slt, %32, %35 : vector<1x256xi32>
    %c0_i32_16 = arith.constant 0 : i32
    %37 = arith.cmpi slt, %30, %c0_i32_16 : i32
    %38 = vector.broadcast %37 : i1 to vector<1x256xi1>
    %39 = vector.broadcast %38 : vector<1x256xi1> to vector<1x256xi1>
    %40 = arith.xori %36, %39 : vector<1x256xi1>
    %41 = arith.andi %40, %34 : vector<1x256xi1>
    %42 = vector.broadcast %30 : i32 to vector<1x256xi32>
    %43 = arith.addi %32, %42 : vector<1x256xi32>
    %44 = arith.select %41, %43, %32 : vector<1x256xi1>, vector<1x256xi32>
    %c1_i32_17 = arith.constant 1 : i32
    %45 = vector.broadcast %c1_i32_17 : i32 to vector<1x256xi32>
    %46 = arith.cmpi sge, %44, %45 : vector<1x256xi32>
    %c14_i32 = arith.constant 14 : i32
    %47 = vector.broadcast %c14_i32 : i32 to vector<1x256xi32>
    %48 = arith.cmpi sle, %44, %47 : vector<1x256xi32>
    %49 = vector.extract_strided_slice %27 {offsets = [0, 0], sizes = [8, 256], strides = [1, 1]} : vector<8x290xf32> to vector<8x256xf32>
    %c0_i32_18 = arith.constant 0 : i32
    %50 = arith.sitofp %c0_i32_18 : i32 to f32
    %51 = vector.shape_cast %46 : vector<1x256xi1> to vector<1x256xi1>
    %52 = vector.broadcast %51 : vector<1x256xi1> to vector<8x256xi1>
    %53 = vector.broadcast %50 : f32 to vector<8x256xf32>
    %54 = arith.select %52, %49, %53 : vector<8x256xi1>, vector<8x256xf32>
    %55 = vector.extract_strided_slice %27 {offsets = [0, 1], sizes = [8, 256], strides = [1, 1]} : vector<8x290xf32> to vector<8x256xf32>
    %56 = vector.extract_strided_slice %27 {offsets = [0, 2], sizes = [8, 256], strides = [1, 1]} : vector<8x290xf32> to vector<8x256xf32>
    %c0_i32_19 = arith.constant 0 : i32
    %57 = arith.sitofp %c0_i32_19 : i32 to f32
    %58 = vector.shape_cast %48 : vector<1x256xi1> to vector<1x256xi1>
    %59 = vector.broadcast %58 : vector<1x256xi1> to vector<8x256xi1>
    %60 = vector.broadcast %57 : f32 to vector<8x256xf32>
    %61 = arith.select %59, %56, %60 : vector<8x256xi1>, vector<8x256xf32>
    %62 = vector.extract_strided_slice %27 {offsets = [0, 16], sizes = [8, 256], strides = [1, 1]} : vector<8x290xf32> to vector<8x256xf32>
    %c0_i32_20 = arith.constant 0 : i32
    %63 = arith.sitofp %c0_i32_20 : i32 to f32
    %64 = vector.shape_cast %46 : vector<1x256xi1> to vector<1x256xi1>
    %65 = vector.broadcast %64 : vector<1x256xi1> to vector<8x256xi1>
    %66 = vector.broadcast %63 : f32 to vector<8x256xf32>
    %67 = arith.select %65, %62, %66 : vector<8x256xi1>, vector<8x256xf32>
    %68 = vector.extract_strided_slice %27 {offsets = [0, 17], sizes = [8, 256], strides = [1, 1]} : vector<8x290xf32> to vector<8x256xf32>
    %69 = vector.extract_strided_slice %27 {offsets = [0, 18], sizes = [8, 256], strides = [1, 1]} : vector<8x290xf32> to vector<8x256xf32>
    %c0_i32_21 = arith.constant 0 : i32
    %70 = arith.sitofp %c0_i32_21 : i32 to f32
    %71 = vector.shape_cast %48 : vector<1x256xi1> to vector<1x256xi1>
    %72 = vector.broadcast %71 : vector<1x256xi1> to vector<8x256xi1>
    %73 = vector.broadcast %70 : f32 to vector<8x256xf32>
    %74 = arith.select %72, %69, %73 : vector<8x256xi1>, vector<8x256xf32>
    %75 = vector.extract_strided_slice %27 {offsets = [0, 32], sizes = [8, 256], strides = [1, 1]} : vector<8x290xf32> to vector<8x256xf32>
    %c0_i32_22 = arith.constant 0 : i32
    %76 = arith.sitofp %c0_i32_22 : i32 to f32
    %77 = vector.shape_cast %46 : vector<1x256xi1> to vector<1x256xi1>
    %78 = vector.broadcast %77 : vector<1x256xi1> to vector<8x256xi1>
    %79 = vector.broadcast %76 : f32 to vector<8x256xf32>
    %80 = arith.select %78, %75, %79 : vector<8x256xi1>, vector<8x256xf32>
    %81 = vector.extract_strided_slice %27 {offsets = [0, 33], sizes = [8, 256], strides = [1, 1]} : vector<8x290xf32> to vector<8x256xf32>
    %82 = vector.extract_strided_slice %27 {offsets = [0, 34], sizes = [8, 256], strides = [1, 1]} : vector<8x290xf32> to vector<8x256xf32>
    %c0_i32_23 = arith.constant 0 : i32
    %83 = arith.sitofp %c0_i32_23 : i32 to f32
    %84 = vector.shape_cast %48 : vector<1x256xi1> to vector<1x256xi1>
    %85 = vector.broadcast %84 : vector<1x256xi1> to vector<8x256xi1>
    %86 = vector.broadcast %83 : f32 to vector<8x256xf32>
    %87 = arith.select %85, %82, %86 : vector<8x256xi1>, vector<8x256xf32>
    %88 = tpu.concatenate %54, %55, %61, %67, %68, %74, %80, %81, %87 in 0 : vector<8x256xf32>, vector<8x256xf32>, vector<8x256xf32>, vector<8x256xf32>, vector<8x256xf32>, vector<8x256xf32>, vector<8x256xf32>, vector<8x256xf32>, vector<8x256xf32> -> vector<72x256xf32>
    %c0_24 = arith.constant 0 : index
    %c0_25 = arith.constant 0 : index
    %89 = vector.load %arg4[%c0_24, %c0_25] : memref<8x72xf32, #tpu.memory_space<vmem>>, vector<8x72xf32>
    %cst_26 = arith.constant dense<0.000000e+00> : vector<8x256xf32>
    %90 = tpu.matmul %89, %88, %cst_26 {dimension_numbers = #tpu.dot_dimension_numbers<[1], [0], [0], [1], [0, 0, 1, 1], [], []>} : vector<8x72xf32>, vector<72x256xf32>, vector<8x256xf32> -> vector<8x256xf32>
    %c0_27 = arith.constant 0 : index
    %c2 = arith.constant 2 : index
    %91 = vector.load %arg6[%c0_27, %c2] : memref<8x4xf32, #tpu.memory_space<vmem>>, vector<8x1xf32>
    %92 = vector.broadcast %91 : vector<8x1xf32> to vector<8x256xf32>
    %93 = arith.addf %90, %92 : vector<8x256xf32>
    %c0_28 = arith.constant 0 : index
    %c0_29 = arith.constant 0 : index
    %94 = vector.load %arg5[%c0_28, %c0_29] : memref<8x4xf32, #tpu.memory_space<vmem>>, vector<8x4xf32>
    %c0_30 = arith.constant 0 : index
    %c0_31 = arith.constant 0 : index
    %c0_32 = arith.constant 0 : index
    %95 = vector.load %arg2[%c0_30, %c0_31, %c0_32] : memref<1x4x256xf32, #tpu.memory_space<vmem>>, vector<1x4x256xf32>
    %96 = vector.shape_cast %95 : vector<1x4x256xf32> to vector<4x256xf32>
    %cst_33 = arith.constant dense<0.000000e+00> : vector<8x256xf32>
    %97 = tpu.matmul %94, %96, %cst_33 {dimension_numbers = #tpu.dot_dimension_numbers<[1], [0], [0], [1], [0, 0, 1, 1], [], []>} : vector<8x4xf32>, vector<4x256xf32>, vector<8x256xf32> -> vector<8x256xf32>
    %c0_34 = arith.constant 0 : index
    %c3 = arith.constant 3 : index
    %98 = vector.load %arg6[%c0_34, %c3] : memref<8x4xf32, #tpu.memory_space<vmem>>, vector<8x1xf32>
    %99 = vector.broadcast %98 : vector<8x1xf32> to vector<8x256xf32>
    %100 = arith.addf %97, %99 : vector<8x256xf32>
    %101 = arith.addf %93, %100 : vector<8x256xf32>
    %102 = vector.shape_cast %101 : vector<8x256xf32> to vector<1x8x256xf32>
    %c0_35 = arith.constant 0 : index
    %c0_36 = arith.constant 0 : index
    %c0_37 = arith.constant 0 : index
    %103 = vector.load %arg7[%c0_35, %c0_36, %c0_37] : memref<1x8x256xf32, #tpu.memory_space<vmem>>, vector<1x8x256xf32>
    tpu.vector_store %arg7[%c0_35, %c0_36, %c0_37], %102 {strides = array<i32>} : memref<1x8x256xf32, #tpu.memory_space<vmem>>, vector<1x8x256xf32>,
    return
  }
  func.func @transform_0(%arg0: i32) -> (i32, i32) {
    %c0_i32 = arith.constant 0 : i32
    %c0_i32_0 = arith.constant 0 : i32
    %c0_i32_1 = arith.constant 0 : i32
    return %c0_i32, %c0_i32_0 : i32, i32
  }
  func.func @transform_1(%arg0: i32) -> (i32, i32, i32) {
    %c0_i32 = arith.constant 0 : i32
    %c0_i32_0 = arith.constant 0 : i32
    %c0_i32_1 = arith.constant 0 : i32
    return %arg0, %c0_i32, %c0_i32_0 : i32, i32, i32
  }
  func.func @transform_2(%arg0: i32) -> (i32, i32, i32) {
    %c0_i32 = arith.constant 0 : i32
    %c0_i32_0 = arith.constant 0 : i32
    %c0_i32_1 = arith.constant 0 : i32
    return %arg0, %c0_i32, %c0_i32_0 : i32, i32, i32
  }
  func.func @transform_3(%arg0: i32) -> (i32, i32) {
    %c0_i32 = arith.constant 0 : i32
    %c0_i32_0 = arith.constant 0 : i32
    %c0_i32_1 = arith.constant 0 : i32
    return %c0_i32, %c0_i32_0 : i32, i32
  }
  func.func @transform_4(%arg0: i32) -> (i32, i32) {
    %c0_i32 = arith.constant 0 : i32
    %c0_i32_0 = arith.constant 0 : i32
    %c0_i32_1 = arith.constant 0 : i32
    return %c0_i32, %c0_i32_0 : i32, i32
  }
  func.func @transform_5(%arg0: i32) -> (i32, i32) {
    %c0_i32 = arith.constant 0 : i32
    %c0_i32_0 = arith.constant 0 : i32
    %c0_i32_1 = arith.constant 0 : i32
    return %c0_i32, %c0_i32_0 : i32, i32
  }
  func.func @transform_6(%arg0: i32) -> (i32, i32, i32) {
    %c0_i32 = arith.constant 0 : i32
    %c0_i32_0 = arith.constant 0 : i32
    %c0_i32_1 = arith.constant 0 : i32
    return %arg0, %c0_i32, %c0_i32_0 : i32, i32, i32
  }
}

</mosaic_0001>

<bundles_post_ra>
// kernel: _resblock_forward_impl.3
= control target key start
LH: loop header
LB: loop body
LE: loop exit
PB: predicated region body
PF: predicated region fallthrough
CT: control target
= control target key end

     0   :  { %s229_s6 = smov 0   ;;  %s246_s0 = inlined_call_operand.vmem [shape: f32[2,4,256], index: 0, kind: input, shape index: {}]   ;;  %s247_s1 = inlined_call_operand.vmem [shape: f32[2,4,2], index: 1, kind: output, shape index: {}]  }
   0x1 LB: > { %s191_s7 = sadd.s32 4294967295, %s217_s6   ;;  %p195_p0 = scmp.ge.s32.totalorder %s217_s6, 1  ;;  %s217_s6 = sphi %s229_s6, %s11_s6  }
   0x2   : > { %p87_p1 = scmp.lt.s32.totalorder %s217_s6, 3 }
   0x4   : > { %p88_p2 = pnand %p195_p0, %p87_p1 }
   0x5   : > { %p106_p3 = scmp.lt.s32.totalorder (!%p88_p2), %s191_s7, 1  ;;  %vm119_vm0 = vcmask (!%p88_p2), 1043456   ;;  %vm134_vm1 = vcmask (!%p88_p2), 7168   ;;  %vm136_vm2 = vcmask (!%p88_p2), 11264  }
   0x6   : > { %91 = sbr.rel (%p88_p2) target bundleno = 170 (0xaa), region = 24 }
   0xd   : > { %s249_s7 = smov (!%p106_p3, %s191_s7), 1 }
   0xe   : > { %s201_s8 = sshll.u32 %s249_s7, 3  ;;  %s198_s12 = sshll.u32 %s249_s7, 2 }
   0xf   : > { %s110_s11 = scalar_lea.vmem %s246_s0, %s201_s8  ;;  %s114_s15 = scalar_lea.vmem %s247_s1, %s198_s12 }
  0x10   : > { %v115_v0 = vld [vmem:[%s110_s11] sm:$0xff] }
  0x11   : > { %v117_v1 = vcombine.high %v115_v0, %v115_v0  ;;  %v120_v2 = vsel %vm119_vm0, %v115_v0, 0.0  ;;  %v125_v3 = vmul.f32 %v115_v0, %v115_v0 }
  0x13   : > { %v121_v4 = vsel %vm119_vm0, %v117_v1, 0.0  ;;  %v127_v5 = vcombine.high %v125_v3, %v125_v3  ;;  %v129_v6 = vsel %vm119_vm0, %v125_v3, 0.0 }
  0x14   : > { %v122_v7 = vadd.f32 %v121_v4, %v120_v2 }
  0x15   : > { %v130_v8 = vsel %vm119_vm0, %v127_v5, 0.0 }
  0x16   : > { %123 = vadd.xlane.f32.xlu0 %v122_v7  ;;  %v131_v9 = vadd.f32 %v130_v8, %v129_v6 }
  0x1a   : > { %132 = vadd.xlane.f32.xlu0 %v131_v9 }
  0xa3   : > { %v124_v10 = vpop.xlane.xlu0 %123 }
  0xa7   : > { %v133_v11 = vpop.xlane.xlu0 %132 }
  0xa8   : > { %v135_v12 = vsel %vm134_vm1, %v124_v10, %v133_v11 }
  0xa9   : > { %137 = vst.msk [vmem:[%s114_s15] sm:$0xf] %vm136_vm2, %v135_v12 }
  0xaa PF: > { %s11_s6 = sadd.s32 1, %s217_s6  }
  0xab   : > { %p8_p4 = scmp.ge.s32.totalorder %s11_s6, 4  }
  0xad   :  { %10 = sbr.rel (!%p8_p4) target bundleno = 1 (0x1), region = 54 }

// kernel: _resblock_forward_impl.5
= control target key start
LH: loop header
LB: loop body
LE: loop exit
PB: predicated region body
PF: predicated region fallthrough
CT: control target
= control target key end

     0   :  { %s894_s21 = smov 0   ;;  %s1021_s0 = inlined_call_operand.vmem [shape: f32[8,2], index: 0, kind: input, shape index: {}]   ;;  %s1022_s1 = inlined_call_operand.vmem [shape: f32[2,4,256], index: 1, kind: input, shape index: {}]   ;;  %s1023_s2 = inlined_call_operand.vmem [shape: f32[2,8,256], index: 2, kind: input, shape index: {}]   ;;  %s1024_s3 = inlined_call_operand.vmem [shape: f32[8,72], index: 3, kind: input, shape index: {}]   ;;  %s1025_s4 = inlined_call_operand.vmem [shape: f32[8,4], index: 4, kind: input, shape index: {}]   ;;  %s1026_s5 = inlined_call_operand.vmem [shape: f32[8,4], index: 5, kind: input, shape index: {}]   ;;  %s1027_s6 = inlined_call_operand.vmem [shape: f32[2,8,256], index: 6, kind: output, shape index: {}]  }
   0x1 LB: > { %s707_s22 = sadd.s32 4294967295, %s841_s21   ;;  %p711_p0 = scmp.ge.s32.totalorder %s841_s21, 1  ;;  %s841_s21 = sphi %s894_s21, %s16_s21  }
   0x2   : > { %p222_p1 = scmp.lt.s32.totalorder %s841_s21, 3 }
   0x4   : > { %p223_p2 = pnand %p711_p0, %p222_p1 }
   0x5   : > { %v275_v0 = vld [vmem:[%s1021_s0] sm:$0xff] (!%p223_p2)  ;;  %s843_s25 = smov (!%p223_p2), 1   ;;  %v844_v7 = vmov (!%p223_p2), 0   ;;  %s845_s26 = smov (!%p223_p2), 127   ;;  %v846_v9 = vmov (!%p223_p2), 1   ;;  %vm319_vm0 = vcmask (!%p223_p2), 138240   ;;  %v326_v38 = vlaneseq (!%p223_p2) }
   0x6   : > { %226 = sbr.rel (%p223_p2) target bundleno = 1001 (0x3e9), region = 44  ;;  %v276_v1 = vmul.f32 (!%p223_p2), 0.001953125, %v275_v0  ;;  %793 = vset.pattern.permute.xlu1 (!%p223_p2), %v844_v7  ;;  %794 = vset.pattern.permute.xlu0 (!%p223_p2), %v846_v9  ;;  %v909_v10 = vld [vmem:[%s1026_s5] sm:$0xff] (!%p223_p2)  ;;  %p257_p3 = scmp.lt.s32.totalorder (!%p223_p2), %s707_s22, 1  ;;  %v854_v33 = vmov (!%p223_p2), 0.0   ;;  %vm560_vm1 = vcmask (!%p223_p2), 1043456  }
   0x7   : > { %s847_s9 = smov (!%p223_p2), 17   ;;  %s848_s10 = smov (!%p223_p2), 112   ;;  %541 = vmatprep.mubr.f32.mxu1 (!%p223_p2), %v854_v33  ;;  %629 = vmatprep.mubr.f32.mxu0 (!%p223_p2), %v854_v33  ;;  %v855_v35 = vmov (!%p223_p2), 2   ;;  %v548_v36 = vld [vmem:[%s1025_s4] sm:$0xff] (!%p223_p2)  ;;  %vm556_vm2 = vcmask (!%p223_p2), 31744   ;;  %v856_v37 = vmov (!%p223_p2), 3  }
   0x8   : > { %v277_v2 = vmul.f32 (!%p223_p2), %v276_v1, %v276_v1  ;;  %s849_s11 = smov (!%p223_p2), 126   ;;  %s850_s12 = smov (!%p223_p2), 111   ;;  %v327_v39 = vand.u32 (!%p223_p2), 127, %v326_v38  ;;  %vm440_vm4 = vcmask (!%p223_p2), 1039360   ;;  %vm388_vm6 = vcmask (!%p223_p2), 916480  }
   0x9   : > { %s851_s13 = smov (!%p223_p2), 110   ;;  %s852_s14 = smov (!%p223_p2), 95   ;;  %vm858_vm7 = vmmov (!%p223_p2), 1   ;;  %vm375_vm11 = vcmask (!%p223_p2), 1031168   ;;  %vm451_vm15 = vcmask (!%p223_p2), 908288  }
   0xa   : > { %279 = vrot.lane.b32.xlu0 (!%p223_p2), %v277_v2, %s843_s25  ;;  %s853_s19 = smov (!%p223_p2), 96   ;;  %s857_s24 = smov (!%p223_p2), 94   ;;  %v328_v40 = vadd.s32 (!%p223_p2), 128, %v327_v39  ;;  %v333_v43 = vand.u32 (!%p223_p2), 15, %v327_v39  ;;  %v467_v39 = vld [vmem:[%s1024_s3] sm:$0xff] (!%p223_p2) }
   0xc   : > { %v340_v42 = vand.u32 (!%p223_p2), 15, %v328_v40  ;;  %vm954_vm5 = vcmp.ge.s32.totalorder (!%p223_p2), %v333_v43, 1  ;;  %vm980_vm12 = vcmp.le.s32.totalorder (!%p223_p2), %v333_v43, 14 }
   0xd   : > { %s1041_s22 = smov (!%p257_p3, %s707_s22), 1  ;;  %vm974_vm10 = vmpackc.low %vm858_vm7, %vm954_vm5 }
   0xe   : > { %s737_s29 = sshll.u32 %s1041_s22, 4  ;;  %s736_s15 = sshll.u32 %s1041_s22, 3  ;;  %vm950_vm3 = vcmp.ge.s32.totalorder %v340_v42, 1  ;;  %vm965_vm9 = vcmp.le.s32.totalorder %v340_v42, 14  ;;  %vm749_vm14 = vmpackc.low %vm954_vm5, %vm980_vm12  ;;  %vm427_vm5 = vcmask 769024  }
   0xf   : > { %s266_s8 = scalar_lea.vmem %s1023_s2, %s737_s29  ;;  %s261_s18 = scalar_lea.vmem %s1022_s1, %s736_s15  ;;  %vm961_vm8 = vmpackc.low %vm858_vm7, %vm950_vm3 }
  0x10   : > { %v272_v17 = vld [vmem:[%s266_s8] sm:$0xff]  ;;  %v273_v18 = vld [vmem:[%s266_s8 + $0x8] sm:$0xff]  ;;  %vm746_vm13 = vmpackc.low %vm950_vm3, %vm965_vm9  ;;  %vm462_vm3 = vcmask 777216   ;;  %s271_s30 = scalar_lea.vmem %s1027_s6, %s737_s29 }
  0x11   : > { %v549_v32 = vld [vmem:[%s261_s18] sm:$0xff] }
  0x12   : > { %v555_v34 = vcombine.high %v549_v32, %v549_v32 }
  0x14   : > { %731 = vmatprep.subr.msk.mxu0 %vm560_vm1, %v555_v34 }
  0x15   : > { %732 = vmatpush1.msk.msra.mxu0 %vm560_vm1, %v549_v32  ;;  %vm752_vm1 = vmpackc.low %vm965_vm9, %vm858_vm7 }
  0x16   : > { %733 = vmatmul.mubr.msk.f32.vlgmr.msra.gmra.mrb[0].mxu0 %vm556_vm2, %v548_v36  ;;  %vm755_vm2 = vmpackc.low %vm980_vm12, %vm858_vm7 }
  0x7c   : > { %v280_v3 = vpop.permute.xlu0 %279 }
  0x7d   : > { %v282_v4 = vsub.f32 %v276_v1, %v280_v3 }
  0x7f   : > { %v283_v5 = vmax.f32 %v282_v4, 0.0 }
  0x81   : > { %v284_v6 = vadd.f32 1e-05, %v283_v5 }
  0x83   : > { %833 = vrsqrt.f32 %v284_v6 }
  0x8d   : > { %v834_v8 = vpop.eup %833 }
  0x8e   : > { %287 = vrot.lane.b32.xlu0 %v834_v8, %s845_s26 }
 0x100   : > { %v288_v11 = vpop.permute.xlu0 %287 }
 0x101   : > { %v290_v12 = vmul.f32 %v288_v11, %v909_v10 }
 0x103   : > { %v291_v13 = vmul.f32 %v290_v12, %v276_v1 }
 0x105   : > { %293 = vrot.lane.b32.xlu1 %v291_v13, %s843_s25 }
 0x109   : > { %299 = vperm.xlu1 %793, %v290_v12  }
 0x10d   : > { %830 = vset.pattern.permute.xlu1 %v855_v35 }
 0x177   : > { %v294_v14 = vpop.permute.xlu1 %293 }
 0x178   : > { %v296_v15 = vsub.f32 %v909_v10, %v294_v14 }
 0x17a   : > { %306 = vperm.xlu0 %794, %v296_v15  }
 0x17e   : > { %831 = vset.pattern.permute.xlu0 %v856_v37 }
 0x188   : > { %v300_v16 = vpop.permute.xlu1 %299 }
 0x189   : > { %v302_v19 = vmul.f32 %v300_v16, %v272_v17  ;;  %v303_v21 = vmul.f32 %v300_v16, %v273_v18 }
 0x1f9   : > { %v307_v20 = vpop.permute.xlu0 %306 }
 0x1fa   : > { %v309_v22 = vadd.f32 %v307_v20, %v302_v19  ;;  %v310_v23 = vadd.f32 %v307_v20, %v303_v21 }
 0x1fc   : > { %v311_v24 = vmax.f32 %v309_v22, 0.0  ;;  %v312_v25 = vmax.f32 %v310_v23, 0.0 }
 0x1fe   : > { %315 = vrot.lane.b32.xlu1 %v311_v24, %s847_s9 }
 0x202   : > { %317 = vrot.lane.b32.xlu1 %v312_v25, %s847_s9 }
 0x270   : > { %v316_v26 = vpop.permute.xlu1 %315 }
 0x271   : > { %v925_v27 = vsel %vm319_vm0, 0.0, %v316_v26 }
 0x272   : > { %434 = vrot.lane.b32.xlu1 %v925_v27, %s845_s26 }
 0x274   : > { %v318_v28 = vpop.permute.xlu1 %317 }
 0x275   : > { %v929_v29 = vsel %vm319_vm0, %v316_v26, %v318_v28  ;;  %v325_v30 = vsel %vm319_vm0, %v318_v28, 0.0  ;;  %vm401_vm0 = vcmask 900096  }
 0x276   : > { %v805_v31 = vpack.i.bf16 %v325_v30, %v929_v29 }
 0x278   : > { %806 = vrot.lane.b32.xlu1 %v805_v31, %s848_s10  ;;  %796 = vrot.lane.b32.xlu0 %v805_v31, %s845_s26 }
 0x27c   : > { %382 = vrot.lane.b32.xlu1 %v925_v27, %s848_s10  ;;  %801 = vrot.lane.b32.xlu0 %v805_v31, %s849_s11 }
 0x280   : > { %816 = vrot.lane.b32.xlu1 %v805_v31, %s850_s12  ;;  %369 = vrot.lane.b32.xlu0 %v925_v27, %s849_s11 }
 0x284   : > { %445 = vrot.lane.b32.xlu1 %v925_v27, %s850_s12  ;;  %811 = vrot.lane.b32.xlu0 %v805_v31, %s851_s13 }
 0x288   : > { %826 = vrot.lane.b32.xlu1 %v805_v31, %s852_s14  ;;  %395 = vrot.lane.b32.xlu0 %v925_v27, %s851_s13 }
 0x28c   : > { %456 = vrot.lane.b32.xlu1 %v925_v27, %s852_s14  ;;  %821 = vrot.lane.b32.xlu0 %v805_v31, %s853_s19 }
 0x290   : > { %425 = vrot.lane.b32.xlu1 %v325_v30, %s857_s24  ;;  %408 = vrot.lane.b32.xlu0 %v925_v27, %s853_s19 }
 0x294   : > { %423 = vrot.lane.b32.xlu0 %v929_v29, %s857_s24  ;;  %470 = vperm.xlu1 %830, %v909_v10  }
 0x298   : > { %421 = vrot.lane.b32.xlu0 %v925_v27, %s857_s24 }
 0x29c   : > { %551 = vperm.xlu0 %831, %v909_v10  }
 0x2e4   : > { %v435_v41 = vpop.permute.xlu1 %434 }
 0x2ea   : > { %v797_v44 = vpop.permute.xlu0 %796  ;;  %v807_v45 = vpop.permute.xlu1 %806 }
 0x2eb   : > { %v799_v47 = vunpack.i.h.bf16 %v797_v44  ;;  %v798_v48 = vunpack.i.l.bf16 %v797_v44  ;;  %v809_v50 = vunpack.i.h.bf16 %v807_v45  ;;  %v808_v51 = vunpack.i.l.bf16 %v807_v45 }
 0x2ed   : > { %v442_v52 = vsel %vm440_vm4, %v798_v48, %v799_v47  ;;  %v441_v54 = vsel %vm440_vm4, %v435_v41, %v798_v48  ;;  %v390_v0 = vsel %vm388_vm6, %v808_v51, %v809_v50  ;;  %vm414_vm4 = vcmask 785408   ;;  %v631_v41 = vpop.f32.mrb[0].mxu0 }
 0x2ee   : > { %v802_v55 = vpop.permute.xlu0 %801  ;;  %v383_v56 = vpop.permute.xlu1 %382  ;;  %v739_v58 = vpack.c.bf16 %v442_v52, %v929_v29  ;;  %v742_v59 = vpack.c.bf16 %v441_v54, %v925_v27 }
 0x2ef   : > { %v804_v61 = vunpack.i.h.bf16 %v802_v55  ;;  %v803_v62 = vunpack.i.l.bf16 %v802_v55  ;;  %v389_v5 = vsel %vm388_vm6, %v383_v56, %v808_v51  ;;  %vm473_vm6 = vcmask 588800   ;;  %v633_v42 = vpop.f32.mrb[1].mxu0 }
 0x2f0   : > { %741 = vmatprep.subr.msk.bf16.mxu1 %vm961_vm8, %v739_v58 }
 0x2f1   : > { %744 = vmatpush1.bf16.msk.msra.mxu1 %vm974_vm10, %v742_v59  ;;  %v377_v1 = vsel %vm375_vm11, %v803_v62, %v804_v61 }
 0x2f2   : > { %v370_v2 = vpop.permute.xlu0 %369  ;;  %v745_v3 = vpack.c.bf16 %v390_v0, %v377_v1  ;;  %v817_v4 = vpop.permute.xlu1 %816 }
 0x2f3   : > { %v376_v6 = vsel %vm375_vm11, %v370_v2, %v803_v62  ;;  %v819_v8 = vunpack.i.h.bf16 %v817_v4  ;;  %v818_v9 = vunpack.i.l.bf16 %v817_v4 }
 0x2f4   : > { %v748_v7 = vpack.c.bf16 %v389_v5, %v376_v6  ;;  %747 = vmatprep.subr.msk.bf16.mxu1 %vm746_vm13, %v745_v3 }
 0x2f5   : > { %v453_v14 = vsel %vm451_vm15, %v818_v9, %v819_v8 }
 0x2f6   : > { %v812_v10 = vpop.permute.xlu0 %811  ;;  %v446_v11 = vpop.permute.xlu1 %445  ;;  %750 = vmatpush1.bf16.msk.msra.mxu1 %vm749_vm14, %v748_v7 }
 0x2f7   : > { %v814_v12 = vunpack.i.h.bf16 %v812_v10  ;;  %v813_v13 = vunpack.i.l.bf16 %v812_v10  ;;  %v452_v19 = vsel %vm451_vm15, %v446_v11, %v818_v9 }
 0x2f9   : > { %v403_v15 = vsel %vm401_vm0, %v813_v13, %v814_v12 }
 0x2fa   : > { %v396_v16 = vpop.permute.xlu0 %395  ;;  %v751_v17 = vpack.c.bf16 %v403_v15, %v453_v14  ;;  %v827_v18 = vpop.permute.xlu1 %826 }
 0x2fb   : > { %v402_v20 = vsel %vm401_vm0, %v396_v16, %v813_v13  ;;  %v829_v22 = vunpack.i.h.bf16 %v827_v18  ;;  %v828_v23 = vunpack.i.l.bf16 %v827_v18 }
 0x2fc   : > { %v754_v21 = vpack.c.bf16 %v402_v20, %v452_v19  ;;  %753 = vmatprep.subr.msk.bf16.mxu1 %vm752_vm1, %v751_v17 }
 0x2fd   : > { %v464_v28 = vsel %vm462_vm3, %v828_v23, %v829_v22 }
 0x2fe   : > { %v822_v24 = vpop.permute.xlu0 %821  ;;  %756 = vmatpush1.bf16.msk.msra.mxu1 %vm755_vm2, %v754_v21  ;;  %v457_v27 = vpop.permute.xlu1 %456 }
 0x2ff   : > { %v824_v25 = vunpack.i.h.bf16 %v822_v24  ;;  %v823_v26 = vunpack.i.l.bf16 %v822_v24  ;;  %v463_v32 = vsel %vm462_vm3, %v457_v27, %v828_v23 }
 0x301   : > { %v416_v29 = vsel %vm414_vm4, %v823_v26, %v824_v25 }
 0x302   : > { %v409_v30 = vpop.permute.xlu0 %408  ;;  %v757_v31 = vpack.c.bf16 %v464_v28, %v416_v29  ;;  %v426_v35 = vpop.permute.xlu1 %425 }
 0x303   : > { %v415_v33 = vsel %vm414_vm4, %v409_v30, %v823_v26 }
 0x304   : > { %v760_v34 = vpack.c.bf16 %v463_v32, %v415_v33  ;;  %759 = vmatprep.subr.msk.bf16.mxu1 %vm961_vm8, %v757_v31 }
 0x306   : > { %v424_v36 = vpop.permute.xlu0 %423  ;;  %762 = vmatpush1.bf16.msk.msra.mxu1 %vm974_vm10, %v760_v34 }
 0x307   : > { %v429_v37 = vsel %vm427_vm5, %v424_v36, %v426_v35 }
 0x308   : > { %728 = vmatprep.subr.msk.mxu1 %vm965_vm9, %v429_v37 }
 0x30a   : > { %v422_v38 = vpop.permute.xlu0 %421 }
 0x30b   : > { %v428_v40 = vsel %vm427_vm5, %v422_v38, %v424_v36 }
 0x30c   : > { %729 = vmatpush1.msk.msra.mxu1 %vm980_vm12, %v428_v40 }
 0x30d   : > { %730 = vmatmul.mubr.msk.f32.vlgmr.msra.gmra.mrb[0].mxu1 %vm473_vm6, %v467_v39 }
 0x313   : > { %v471_v43 = vpop.permute.xlu1 %470 }
 0x31b   : > { %v552_v45 = vpop.permute.xlu0 %551 }
 0x3e0   : > { %v543_v44 = vpop.f32.mrb[0].mxu1 }
 0x3e1   : > { %v544_v46 = vadd.f32 %v543_v44, %v471_v43  ;;  %v545_v47 = vpop.f32.mrb[1].mxu1 }
 0x3e2   : > { %v546_v48 = vadd.f32 %v545_v47, %v471_v43 }
 0x3e3   : > { %v764_v49 = vadd.f32 %v552_v45, %v544_v46 }
 0x3e4   : > { %v767_v50 = vadd.f32 %v552_v45, %v546_v48 }
 0x3e5   : > { %v765_v51 = vadd.f32 %v764_v49, %v631_v41 }
 0x3e6   : > { %v768_v52 = vadd.f32 %v767_v50, %v633_v42 }
 0x3e7   : > { %638 = vst [vmem:[%s271_s30] sm:$0xff] %v765_v51 }
 0x3e8   : > { %639 = vst [vmem:[%s271_s30 + $0x8] sm:$0xff] %v768_v52 }
 0x3e9 PF: > { %s16_s21 = sadd.s32 1, %s841_s21  }
 0x3ea   : > { %p13_p4 = scmp.ge.s32.totalorder %s16_s21, 4  }
 0x3ec   :  { %15 = sbr.rel (!%p13_p4) target bundleno = 1 (0x1), region = 77 }

// kernel: _resblock_forward_impl.4
= control target key start
LH: loop header
LB: loop body
LE: loop exit
PB: predicated region body
PF: predicated region fallthrough
CT: control target
= control target key end

     0   :  { %s795_s18 = smov 0   ;;  %s941_s0 = inlined_call_operand.vmem [shape: f32[4,2], index: 0, kind: input, shape index: {}]   ;;  %s942_s1 = inlined_call_operand.vmem [shape: f32[2,4,256], index: 1, kind: input, shape index: {}]   ;;  %s943_s2 = inlined_call_operand.vmem [shape: f32[8,36], index: 2, kind: input, shape index: {}]   ;;  %s944_s3 = inlined_call_operand.vmem [shape: f32[8,4], index: 3, kind: input, shape index: {}]   ;;  %s945_s4 = inlined_call_operand.vmem [shape: f32[2,8,256], index: 4, kind: output, shape index: {0}]   ;;  %s946_s5 = inlined_call_operand.vmem [shape: f32[2,8,2], index: 5, kind: output, shape index: {1}]  }
   0x1 LB: > { %s653_s19 = sadd.s32 4294967295, %s748_s18   ;;  %p657_p0 = scmp.ge.s32.totalorder %s748_s18, 1  ;;  %s748_s18 = sphi %s795_s18, %s16_s18  }
   0x2   : > { %p190_p1 = scmp.lt.s32.totalorder %s748_s18, 3 }
   0x4   : > { %p191_p2 = pnand %p657_p0, %p190_p1 }
   0x5   : > { %v238_v0 = vld [vmem:[%s941_s0] sm:$0xf] (!%p191_p2)  ;;  %s750_s22 = smov (!%p191_p2), 1   ;;  %v751_v7 = vmov (!%p191_p2), 0   ;;  %s752_s23 = smov (!%p191_p2), 127   ;;  %v753_v9 = vmov (!%p191_p2), 1   ;;  %v267_v18 = vlaneseq (!%p191_p2) }
   0x6   : > { %194 = sbr.rel (%p191_p2) target bundleno = 1148 (0x47c), region = 36  ;;  %v239_v1 = vmul.f32 (!%p191_p2), 0.001953125, %v238_v0  ;;  %701 = vset.pattern.permute.xlu1 (!%p191_p2), %v751_v7  ;;  %702 = vset.pattern.permute.xlu0 (!%p191_p2), %v753_v9  ;;  %v237_v10 = vld [vmem:[%s944_s3] sm:$0xf] (!%p191_p2)  ;;  %p222_p3 = scmp.lt.s32.totalorder (!%p191_p2), %s653_s19, 1  ;;  %vm293_vm0 = vcmask (!%p191_p2), 138240  }
   0x7   : > { %v754_v16 = vmov (!%p191_p2), 839922192   ;;  %v268_v20 = vshrl.u32 (!%p191_p2), %v267_v18, 7  ;;  %s755_s30 = smov (!%p191_p2), 17   ;;  %v822_v31 = vand.u32 (!%p191_p2), 127, %v267_v18  ;;  %s756_s6 = smov (!%p191_p2), 112  }
   0x8   : > { %v240_v2 = vmul.f32 (!%p191_p2), %v239_v1, %v239_v1  ;;  %v265_v17 = vunpack.c.l.s4 (!%p191_p2), %v754_v16  ;;  %s757_s7 = smov (!%p191_p2), 126   ;;  %s758_s8 = smov (!%p191_p2), 110   ;;  %v763_v49 = vmov (!%p191_p2), 0.0   ;;  %v466_v50 = vld [vmem:[%s944_s3] sm:$0xff] (!%p191_p2)  ;;  %v764_v51 = vmov (!%p191_p2), 2  }
   0x9   : > { %v307_v32 = vand.u32 (!%p191_p2), 15, %v822_v31  ;;  %v826_v33 = vadd.s32 (!%p191_p2), 128, %v822_v31  ;;  %s759_s9 = smov (!%p191_p2), 96   ;;  %s760_s10 = smov (!%p191_p2), 95   ;;  %546 = vmatprep.mubr.f32.mxu0 (!%p191_p2), %v763_v49  ;;  %vm362_vm3 = vcmask (!%p191_p2), 916480   ;;  %vm349_vm4 = vcmask (!%p191_p2), 1031168  }
   0xa   : > { %242 = vrot.lane.b32.xlu0 (!%p191_p2), %v240_v2, %s750_s22  ;;  %v266_v19 = vunpack.c.0.s8 (!%p191_p2), %v265_v17  ;;  %s761_s11 = smov (!%p191_p2), 111   ;;  %s762_s12 = smov (!%p191_p2), 94   ;;  %vm375_vm5 = vcmask (!%p191_p2), 900096   ;;  %vm456_vm7 = vcmask (!%p191_p2), 1043456   ;;  %vm388_vm9 = vcmask (!%p191_p2), 785408  }
   0xb   : > { %vm830_vm1 = vcmp.ge.s32.totalorder (!%p191_p2), %v307_v32, 1  ;;  %v314_v37 = vand.u32 (!%p191_p2), 15, %v826_v33  ;;  %vm868_vm6 = vcmp.le.s32.totalorder (!%p191_p2), %v307_v32, 14  ;;  %vm451_vm10 = vcmask (!%p191_p2), 777216  }
   0xc   : > { %v269_v21 = vsub.s32 (!%p191_p2), %v266_v19, %v268_v20  ;;  %vm434_vm11 = vcmask (!%p191_p2), 908288   ;;  %vm417_vm12 = vcmask (!%p191_p2), 1039360   ;;  %vm401_vm13 = vcmask (!%p191_p2), 769024  }
   0xd   : > { %s956_s19 = smov (!%p222_p3, %s653_s19), 1  ;;  %vm845_vm2 = vcmp.ge.s32.totalorder %v314_v37, 1  ;;  %vm874_vm8 = vcmp.le.s32.totalorder %v314_v37, 14  ;;  %vm472_vm14 = vcmask 293888   ;;  %vm563_vm15 = vcmask 7168  }
   0xe   : > { %s668_s26 = sshll.u32 %s956_s19, 3  ;;  %s669_s17 = sshll.u32 %s956_s19, 4 }
   0xf   : > { %s226_s29 = scalar_lea.vmem %s942_s1, %s668_s26  ;;  %s235_s25 = scalar_lea.vmem %s946_s5, %s668_s26 }
  0x10   : > { %v236_v24 = vld [vmem:[%s226_s29] sm:$0xff] }
  0x7c   : > { %v243_v3 = vpop.permute.xlu0 %242 }
  0x7d   : > { %v245_v4 = vsub.f32 %v239_v1, %v243_v3 }
  0x7f   : > { %v246_v5 = vmax.f32 %v245_v4, 0.0 }
  0x81   : > { %v247_v6 = vadd.f32 1e-05, %v246_v5 }
  0x83   : > { %740 = vrsqrt.f32 %v247_v6 }
  0x8d   : > { %v741_v8 = vpop.eup %740 }
  0x8e   : > { %250 = vrot.lane.b32.xlu0 %v741_v8, %s752_s23 }
 0x100   : > { %v251_v11 = vpop.permute.xlu0 %250 }
 0x101   : > { %v253_v12 = vmul.f32 %v251_v11, %v237_v10 }
 0x103   : > { %v254_v13 = vmul.f32 %v253_v12, %v239_v1 }
 0x105   : > { %256 = vrot.lane.b32.xlu1 %v254_v13, %s750_s22  ;;  %s231_s22 = scalar_lea.vmem %s945_s4, %s669_s17 }
 0x109   : > { %262 = vperm.xlu1 %701, %v253_v12  }
 0x10d   : > { %738 = vset.pattern.permute.xlu1 %v764_v51 }
 0x177   : > { %v257_v14 = vpop.permute.xlu1 %256 }
 0x178   : > { %v259_v15 = vsub.f32 %v237_v10, %v257_v14 }
 0x17a   : > { %275 = vperm.xlu0 %702, %v259_v15  }
 0x17e   : > { %739 = vset.pattern.permute.xlu0 %v764_v51 }
 0x188   : > { %v263_v22 = vpop.permute.xlu1 %262 }
 0x189   : > { %v270_v23 = vrot.slane %v263_v22, %v269_v21 }
 0x18b   : > { %v272_v26 = vmul.f32 %v270_v23, %v236_v24 }
 0x1f9   : > { %v276_v25 = vpop.permute.xlu0 %275 }
 0x1fa   : > { %v283_v27 = vrot.slane %v276_v25, %v269_v21 }
 0x1fc   : > { %v285_v28 = vadd.f32 %v283_v27, %v272_v26 }
 0x1fe   : > { %v286_v29 = vmax.f32 %v285_v28, 0.0 }
 0x200   : > { %289 = vrot.lane.b32.xlu1 %v286_v29, %s755_s30  ;;  %v288_v30 = vcombine.high %v286_v29, %v286_v29 }
 0x204   : > { %291 = vrot.lane.b32.xlu1 %v288_v30, %s755_s30 }
 0x272   : > { %v290_v34 = vpop.permute.xlu1 %289 }
 0x273   : > { %v834_v36 = vsel %vm293_vm0, 0.0, %v290_v34 }
 0x274   : > { %356 = vrot.lane.b32.xlu1 %v834_v36, %s756_s6  ;;  %v335_v38 = vsel %vm830_vm1, %v834_v36, 0.0  ;;  %v408_v45 = vrot.slane %v834_v36, 4 }
 0x276   : > { %v292_v39 = vpop.permute.xlu1 %291 }
 0x277   : > { %v841_v40 = vsel %vm293_vm0, %v290_v34, %v292_v39  ;;  %v299_v41 = vsel %vm293_vm0, %v292_v39, 0.0  ;;  %vm565_vm0 = vcmask 15360  }
 0x278   : > { %343 = vrot.lane.b32.xlu1 %v834_v36, %s757_s7  ;;  %v703_v43 = vpack.i.bf16 %v299_v41, %v841_v40  ;;  %v336_v44 = vsel %vm845_vm2, %v841_v40, 0.0  ;;  %v409_v46 = vrot.slane %v841_v40, 4  ;;  %v410_v47 = vrot.slane %v299_v41, 4 }
 0x27a   : > { %704 = vrot.lane.b32.xlu0 %v703_v43, %s756_s6  ;;  %v733_v48 = vpack.i.bf16 %v410_v47, %v409_v46 }
 0x27c   : > { %369 = vrot.lane.b32.xlu1 %v834_v36, %s758_s8 }
 0x27e   : > { %709 = vrot.lane.b32.xlu0 %v703_v43, %s757_s7 }
 0x280   : > { %382 = vrot.lane.b32.xlu1 %v834_v36, %s759_s9 }
 0x282   : > { %411 = vrot.lane.b32.xlu0 %v408_v45, %s752_s23 }
 0x284   : > { %714 = vrot.lane.b32.xlu1 %v703_v43, %s758_s8 }
 0x286   : > { %719 = vrot.lane.b32.xlu0 %v703_v43, %s759_s9 }
 0x288   : > { %734 = vrot.lane.b32.xlu1 %v733_v48, %s760_s10 }
 0x28a   : > { %724 = vrot.lane.b32.xlu0 %v703_v43, %s761_s11 }
 0x28c   : > { %445 = vrot.lane.b32.xlu1 %v408_v45, %s760_s10 }
 0x28e   : > { %729 = vrot.lane.b32.xlu0 %v733_v48, %s752_s23 }
 0x290   : > { %399 = vrot.lane.b32.xlu1 %v299_v41, %s762_s12 }
 0x292   : > { %428 = vrot.lane.b32.xlu0 %v834_v36, %s761_s11 }
 0x294   : > { %469 = vperm.xlu1 %738, %v466_v50  }
 0x296   : > { %397 = vrot.lane.b32.xlu0 %v841_v40, %s762_s12 }
 0x29a   : > { %395 = vrot.lane.b32.xlu0 %v834_v36, %s762_s12 }
 0x2e6   : > { %v357_v52 = vpop.permute.xlu1 %356 }
 0x2ea   : > { %v344_v53 = vpop.permute.xlu1 %343 }
 0x2ec   : > { %v705_v54 = vpop.permute.xlu0 %704 }
 0x2ed   : > { %v707_v59 = vunpack.i.h.bf16 %v705_v54  ;;  %v706_v60 = vunpack.i.l.bf16 %v705_v54 }
 0x2ee   : > { %v370_v55 = vpop.permute.xlu1 %369 }
 0x2ef   : > { %v363_v3 = vsel %vm362_vm3, %v357_v52, %v706_v60  ;;  %v364_v4 = vsel %vm362_vm3, %v706_v60, %v707_v59 }
 0x2f0   : > { %v710_v56 = vpop.permute.xlu0 %709  ;;  %v368_v16 = vsel %vm845_vm2, %v364_v4, 0.0  ;;  %v367_v17 = vsel %vm830_vm1, %v363_v3, 0.0 }
 0x2f1   : > { %v712_v62 = vunpack.i.h.bf16 %v710_v56  ;;  %v711_v63 = vunpack.i.l.bf16 %v710_v56  ;;  %v425_v26 = vrot.slane %v368_v16, 4  ;;  %v424_v27 = vrot.slane %v367_v17, 4 }
 0x2f2   : > { %v383_v57 = vpop.permute.xlu1 %382 }
 0x2f3   : > { %v351_v7 = vsel %vm349_vm4, %v711_v63, %v712_v62  ;;  %v350_v8 = vsel %vm349_vm4, %v344_v53, %v711_v63  ;;  %v465_v63 = vld [vmem:[%s943_s2] sm:$0xff] }
 0x2f4   : > { %v412_v58 = vpop.permute.xlu0 %411  ;;  %v355_v18 = vsel %vm874_vm8, %v351_v7, 0.0  ;;  %v354_v19 = vsel %vm868_vm6, %v350_v8, 0.0 }
 0x2f5   : > { %v460_v34 = vsel %vm456_vm7, %v355_v18, %v425_v26  ;;  %v459_v37 = vsel %vm456_vm7, %v354_v19, %v424_v27 }
 0x2f6   : > { %v715_v61 = vpop.permute.xlu1 %714 }
 0x2f7   : > { %v717_v0 = vunpack.i.h.bf16 %v715_v61  ;;  %v716_v1 = vunpack.i.l.bf16 %v715_v61 }
 0x2f8   : > { %v720_v2 = vpop.permute.xlu0 %719 }
 0x2f9   : > { %v377_v9 = vsel %vm375_vm5, %v716_v1, %v717_v0  ;;  %v722_v10 = vunpack.i.h.bf16 %v720_v2  ;;  %v721_v11 = vunpack.i.l.bf16 %v720_v2  ;;  %v376_v20 = vsel %vm375_vm5, %v370_v55, %v716_v1 }
 0x2fa   : > { %v735_v12 = vpop.permute.xlu1 %734  ;;  %v381_v23 = vsel %vm874_vm8, %v377_v9, 0.0  ;;  %v380_v32 = vsel %vm868_vm6, %v376_v20, 0.0 }
 0x2fb   : > { %v737_v21 = vunpack.i.h.bf16 %v735_v12  ;;  %v736_v22 = vunpack.i.l.bf16 %v735_v12  ;;  %v390_v24 = vsel %vm388_vm9, %v721_v11, %v722_v10  ;;  %v442_v33 = vrot.slane %v381_v23, 4 }
 0x2fc   : > { %v725_v13 = vpop.permute.xlu0 %724  ;;  %v394_v45 = vsel %vm845_vm2, %v390_v24, 0.0  ;;  %v389_v46 = vsel %vm388_vm9, %v383_v57, %v721_v11  ;;  %v441_v52 = vrot.slane %v380_v32, 4 }
 0x2fd   : > { %v727_v14 = vunpack.i.h.bf16 %v725_v13  ;;  %v726_v15 = vunpack.i.l.bf16 %v725_v13  ;;  %v453_v39 = vsel %vm451_vm10, %v736_v22, %v737_v21  ;;  %v393_v36 = vsel %vm830_vm1, %v389_v46, 0.0 }
 0x2fe   : > { %v446_v31 = vpop.permute.xlu1 %445  ;;  %v464_v40 = vsel %vm456_vm7, %v394_v45, %v453_v39 }
 0x2ff   : > { %v436_v30 = vsel %vm434_vm11, %v726_v15, %v727_v14  ;;  %v452_v55 = vsel %vm451_vm10, %v446_v31, %v736_v22 }
 0x300   : > { %v730_v25 = vpop.permute.xlu0 %729  ;;  %v462_v50 = vsel %vm456_vm7, %v436_v30, %v442_v33  ;;  %v463_v57 = vsel %vm456_vm7, %v393_v36, %v452_v55 }
 0x301   : > { %v732_v28 = vunpack.i.h.bf16 %v730_v25  ;;  %v731_v29 = vunpack.i.l.bf16 %v730_v25 }
 0x303   : > { %v419_v41 = vsel %vm417_vm12, %v731_v29, %v732_v28  ;;  %v418_v43 = vsel %vm417_vm12, %v412_v58, %v731_v29 }
 0x304   : > { %v429_v47 = vpop.permute.xlu0 %428  ;;  %v458_v48 = vsel %vm456_vm7, %v336_v44, %v419_v41  ;;  %v457_v49 = vsel %vm456_vm7, %v335_v38, %v418_v43  ;;  %v674_v44 = vpack.c.bf16 %v464_v40, %v462_v50  ;;  %v400_v38 = vpop.permute.xlu1 %399 }
 0x305   : > { %v435_v51 = vsel %vm434_vm11, %v429_v47, %v726_v15  ;;  %v670_v53 = vpack.c.bf16 %v460_v34, %v458_v48  ;;  %v672_v54 = vpack.c.bf16 %v459_v37, %v457_v49 }
 0x306   : > { %v461_v42 = vsel %vm456_vm7, %v435_v51, %v441_v52 }
 0x307   : > { %671 = vmatprep.subr.bf16.mxu0 %v670_v53  ;;  %v676_v59 = vpack.c.bf16 %v463_v57, %v461_v42 }
 0x308   : > { %v398_v56 = vpop.permute.xlu0 %397  ;;  %673 = vmatpush1.bf16.msra.mxu0 %v672_v54 }
 0x309   : > { %v403_v58 = vsel %vm401_vm13, %v398_v56, %v400_v38  ;;  %675 = vmatprep.subr.bf16.mxu0 %v674_v44 }
 0x30a   : > { %v407_v60 = vsel %vm874_vm8, %v403_v58, 0.0 }
 0x30c   : > { %v396_v61 = vpop.permute.xlu0 %395  ;;  %677 = vmatpush1.bf16.msra.mxu0 %v676_v59 }
 0x30d   : > { %v402_v62 = vsel %vm401_vm13, %v396_v61, %v398_v56  ;;  %663 = vmatprep.subr.msk.mxu0 %vm456_vm7, %v407_v60 }
 0x30e   : > { %v406_v35 = vsel %vm868_vm6, %v402_v62, 0.0 }
 0x310   : > { %664 = vmatpush1.msk.msra.mxu0 %vm456_vm7, %v406_v35 }
 0x311   : > { %665 = vmatmul.mubr.msk.f32.vlgmr.msra.gmra.mrb[0].mxu0 %vm472_vm14, %v465_v63 }
 0x313   : > { %v470_v0 = vpop.permute.xlu1 %469 }
 0x3e4   : > { %v548_v1 = vpop.f32.mrb[0].mxu0 }
 0x3e5   : > { %v549_v2 = vadd.f32 %v548_v1, %v470_v0  ;;  %v550_v3 = vpop.f32.mrb[1].mxu0 }
 0x3e6   : > { %v551_v4 = vadd.f32 %v550_v3, %v470_v0 }
 0x3e7   : > { %553 = vst [vmem:[%s231_s22] sm:$0xff] %v549_v2  ;;  %v558_v5 = vmul.f32 %v549_v2, %v549_v2 }
 0x3e8   : > { %554 = vst [vmem:[%s231_s22 + $0x8] sm:$0xff] %v551_v4  ;;  %v555_v6 = vadd.f32 %v551_v4, %v549_v2  ;;  %v559_v7 = vmul.f32 %v551_v4, %v551_v4 }
 0x3ea   : > { %556 = vadd.xlane.f32.xlu0 %v555_v6  ;;  %v560_v8 = vadd.f32 %v559_v7, %v558_v5 }
 0x3ec   : > { %561 = vadd.xlane.f32.xlu1 %v560_v8 }
 0x477   : > { %v557_v9 = vpop.xlane.xlu0 %556 }
 0x479   : > { %v562_v10 = vpop.xlane.xlu1 %561 }
 0x47a   : > { %v564_v11 = vsel %vm563_vm15, %v557_v9, %v562_v10 }
 0x47b   : > { %566 = vst.msk [vmem:[%s235_s25] sm:$0xff] %vm565_vm0, %v564_v11 }
 0x47c PF: > { %s16_s18 = sadd.s32 1, %s748_s18  }
 0x47d   : > { %p13_p4 = scmp.ge.s32.totalorder %s16_s18, 4  }
 0x47f   :  { %15 = sbr.rel (!%p13_p4) target bundleno = 1 (0x1), region = 78 }

</bundles_post_ra>
